<compile_context>
chip_gen: v7x
topology: tpu7x:2x2x1
jax: 0.10.0
libtpu: 0.0.40
codegen_flags: <defaults>
</compile_context>

<pallas_src>
import functools

import numpy as np
import jax
import jax.numpy as jnp
from jax import lax
from jax.experimental import pallas as pl
from jax.experimental.pallas import tpu as pltpu


def _round_up(a, b):
    return (a + b - 1) // b * b


# --------------------------------------------------------------------------
# Kernel: encoder -> L2 normalize -> vMF sample -> decoder -> per-row SSE
# --------------------------------------------------------------------------
def _vmf_fused_kernel(x_ref, w_ref, eps_ref,
                      wh_ref, bh_ref, wmu_ref, bmu_ref,
                      wdh_ref, bdh_ref, wdm_ref, bdm_ref,
                      z_ref, rse_ref):
    x = x_ref[...]                                          # (T, D) f32

    # ---- encoder: fc_h -> ReLU -> fc_mu -> L2 normalize ----
    h = jnp.dot(x, wh_ref[...], preferred_element_type=jnp.float32) + bh_ref[...]
    h = jnp.maximum(h, 0.0)
    mu = jnp.dot(h, wmu_ref[...], preferred_element_type=jnp.float32) + bmu_ref[...]
    # F.normalize(p=2): x / max(||x||, 1e-12) == x * rsqrt(max(||x||^2, 1e-24))
    mu = mu * lax.rsqrt(jnp.maximum(jnp.sum(mu * mu, axis=-1, keepdims=True),
                                    1e-24))

    # ---- vMF sampling (w and eps drawn outside the kernel) ----
    eps = eps_ref[...]                                      # (T, L)
    w = w_ref[...]                                          # (T, 1)
    nu = eps - jnp.sum(eps * mu, axis=-1, keepdims=True) * mu
    nu = nu * lax.rsqrt(jnp.maximum(jnp.sum(nu * nu, axis=-1, keepdims=True),
                                    1e-24))
    z = w * mu + jnp.sqrt(jnp.maximum(1.0 - w * w, 0.0)) * nu
    z_ref[...] = z

    # ---- decoder: decoder_h -> ReLU -> decoder_mean -> Sigmoid ----
    dh = jnp.dot(z, wdh_ref[...], preferred_element_type=jnp.float32) + bdh_ref[...]
    dh = jnp.maximum(dh, 0.0)
    logits = jnp.dot(dh, wdm_ref[...],
                     preferred_element_type=jnp.float32) + bdm_ref[...]
    recons = jax.nn.sigmoid(logits)     # VMEM temporary only, never stored

    # ---- per-row sum of squared error (no masking: wrapper slices padding) ----
    diff = recons - x
    rse_ref[...] = jnp.sum(diff * diff, axis=-1, keepdims=True)


# --------------------------------------------------------------------------
# Parameter helpers
# --------------------------------------------------------------------------
def init_params(key, original_dim, inter_dim, latent_dim):
    """PyTorch nn.Linear-style init (uniform +-1/sqrt(fan_in)), stored (in, out)."""
    def linear(k, fan_in, fan_out):
        kw, kb = jax.random.split(k)
        bound = 1.0 / np.sqrt(fan_in)
        w = jax.random.uniform(kw, (fan_in, fan_out), jnp.float32, -bound, bound)
        b = jax.random.uniform(kb, (1, fan_out), jnp.float32, -bound, bound)
        return w, b

    k1, k2, k3, k4 = jax.random.split(key, 4)
    w_h, b_h = linear(k1, original_dim, inter_dim)
    w_mu, b_mu = linear(k2, inter_dim, latent_dim)
    w_dh, b_dh = linear(k3, latent_dim, inter_dim)
    w_dm, b_dm = linear(k4, inter_dim, original_dim)
    return dict(w_h=w_h, b_h=b_h, w_mu=w_mu, b_mu=b_mu,
                w_dh=w_dh, b_dh=b_dh, w_dm=w_dm, b_dm=b_dm)


def prepare_kernel_params(params):
    """Zero-pad inter_dim to a multiple of 128 lanes (ReLU(0)=0 -> exact same
    math).  Everything stays f32: the MXU has huge slack at these dims and
    dropping the bf16 casts removes VALU pack work and matches the reference
    numerics more closely."""
    inter = params["w_h"].shape[1]
    ip = _round_up(inter, 128)

    def pad_axis(a, axis, new):
        pad = [(0, 0)] * a.ndim
        pad[axis] = (0, new - a.shape[axis])
        return jnp.pad(a, pad)

    return dict(
        w_h=pad_axis(params["w_h"], 1, ip),
        b_h=pad_axis(params["b_h"], 1, ip),
        w_mu=pad_axis(params["w_mu"], 0, ip),
        b_mu=params["b_mu"],
        w_dh=pad_axis(params["w_dh"], 1, ip),
        b_dh=pad_axis(params["b_dh"], 1, ip),
        w_dm=pad_axis(params["w_dm"], 0, ip),
        b_dm=params["b_dm"],
    )


def build_w_table(dims, kappa=20, table_size=10**6, epsilon=1e-6, seed=0):
    """vMF w table (same construction as _init_w).  epsilon coarser than the
    reference's 1e-7 to bound host memory; the CDF is still smooth here."""
    x = np.arange(-1 + epsilon, 1, epsilon)
    y = kappa * x + np.log(1 - x ** 2) * (dims - 3) / 2
    y = np.cumsum(np.exp(y - y.max()))
    y = y / y[-1]
    rng = np.random.RandomState(seed)
    W = np.interp(rng.random_sample(table_size), y, x).astype(np.float32)
    return jnp.asarray(W)


# --------------------------------------------------------------------------
# Fused forward (both branches in one pallas_call)
# --------------------------------------------------------------------------
_TARGET_TILE_ROWS = 2048   # 1024-2048 sweep range; VMEM-safe on all generations
_MIN_TILES = 2             # v7x has 2 TensorCores; extra grid step is noise elsewhere


def _fused_forward(kp, x, w_samp, eps):
    rows, D = x.shape
    L = eps.shape[1]
    Ip = kp["w_h"].shape[1]

    # num_tiles first, then tile: keeps padding to <8 rows per tile and makes
    # sure the "parallel" axis has >=2 steps so both v7x TCs do work.
    num_tiles = max(1, min(pl.cdiv(rows, 8),
                           max(_MIN_TILES, pl.cdiv(rows, _TARGET_TILE_ROWS))))
    tile = _round_up(pl.cdiv(rows, num_tiles), 8)
    rows_pad = num_tiles * tile
    if rows_pad != rows:
        x = jnp.pad(x, ((0, rows_pad - rows), (0, 0)))
        w_samp = jnp.pad(w_samp, ((0, rows_pad - rows), (0, 0)))
        eps = jnp.pad(eps, ((0, rows_pad - rows), (0, 0)))

    def row_spec(cols):
        return pl.BlockSpec((tile, cols), lambda i: (i, 0))

    def const_spec(arr):
        return pl.BlockSpec(arr.shape, lambda i: (0, 0))

    mm_flops = 2 * rows_pad * (D * Ip + Ip * L + L * Ip + Ip * D)
    cost = pl.CostEstimate(
        flops=mm_flops,
        transcendentals=rows_pad * (D + 3),            # sigmoid + 2 rsqrt + sqrt
        bytes_accessed=4 * rows_pad * (D + 2 * L + 2)  # x, eps, z, w, row_sse
                       + 4 * (D * Ip + Ip * L + L * Ip + Ip * D)   # f32 weights
                       + 4 * (2 * Ip + L + D),                     # f32 biases
    )

    z_pad, row_sse = pl.pallas_call(
        _vmf_fused_kernel,
        grid=(num_tiles,),
        in_specs=[
            row_spec(D), row_spec(1), row_spec(L),
            const_spec(kp["w_h"]), const_spec(kp["b_h"]),
            const_spec(kp["w_mu"]), const_spec(kp["b_mu"]),
            const_spec(kp["w_dh"]), const_spec(kp["b_dh"]),
            const_spec(kp["w_dm"]), const_spec(kp["b_dm"]),
        ],
        out_specs=(
            pl.BlockSpec((tile, L), lambda i: (i, 0)),
            pl.BlockSpec((tile, 1), lambda i: (i, 0)),
        ),
        out_shape=(
            jax.ShapeDtypeStruct((rows_pad, L), jnp.float32),
            jax.ShapeDtypeStruct((rows_pad, 1), jnp.float32),
        ),
        compiler_params=pltpu.CompilerParams(
            dimension_semantics=("parallel",)),
        cost_estimate=cost,
    )(x, w_samp, eps,
      kp["w_h"], kp["b_h"], kp["w_mu"], kp["b_mu"],
      kp["w_dh"], kp["b_dh"], kp["w_dm"], kp["b_dm"])

    # Padded rows are simply dropped here — no in-kernel masking needed.
    sse = jnp.sum(row_sse[:rows])
    return z_pad[:rows], sse


@functools.partial(jax.jit, static_argnames=("batch_size", "latent_dim"))
def model_forward(kparams, W_table, e1, e2, key, batch_size, latent_dim):
    # TODO(synk): batch_mask gating of the MSE is not implemented (None path only).
    B, S, D = e1.shape
    N = B * S
    rows = 2 * N
    x = jnp.concatenate([e1.reshape(N, D), e2.reshape(N, D)], axis=0)

    kw, keps = jax.random.split(key)
    idx = jax.random.randint(kw, (rows,), 0, W_table.shape[0])
    w_samp = jnp.take(W_table, idx).reshape(rows, 1)
    eps = jax.random.normal(keps, (rows, latent_dim), jnp.float32)

    z_all, sse = _fused_forward(kparams, x, w_samp, eps)

    # 0.5*mse(e1) + 0.5*mse(e2) == (sse_e1 + sse_e2) / (2 * N * D)
    loss = sse / jnp.float32(rows * D)
    z1 = z_all[:N].reshape(batch_size, -1, latent_dim)
    z2 = z_all[N:].reshape(batch_size, -1, latent_dim)
    return loss, z1, z2


if __name__ == "__main__":
    batch_size = 2
    seq_len = 8
    original_dim = 32     # args.dist_dim
    inter_dim = 64        # args.topic_inter_map
    latent_dim = 16       # args.topic_dim

    root = jax.random.PRNGKey(0)
    k_params, k_e1, k_e2, k_sample = jax.random.split(root, 4)

    params = init_params(k_params, original_dim, inter_dim, latent_dim)
    kparams = prepare_kernel_params(params)
    W_table = build_w_table(latent_dim, kappa=20)

    # inputs are in [0, 1] (sigmoid reconstruction target regime)
    e1 = jax.random.uniform(k_e1, (batch_size, seq_len, original_dim), jnp.float32)
    e2 = jax.random.uniform(k_e2, (batch_size, seq_len, original_dim), jnp.float32)

    loss, z_e1, z_e2 = model_forward(kparams, W_table, e1, e2, k_sample,
                                     batch_size, latent_dim)
    jax.block_until_ready((loss, z_e1, z_e2))

    assert loss.shape == ()
    assert bool(jnp.isfinite(loss))
    assert z_e1.shape == (batch_size, seq_len, latent_dim)
    assert z_e2.shape == (batch_size, seq_len, latent_dim)
    print("KERNEL_OK")
</pallas_src>

<mosaic_0001>
module attributes {stable_mosaic.version = 11 : i64} {
  func.func @_vmf_fused_kernel(%arg0: i32, %arg1: memref<16x32xf32, #tpu.memory_space<vmem>>, %arg2: memref<16x1xf32, #tpu.memory_space<vmem>>, %arg3: memref<16x16xf32, #tpu.memory_space<vmem>>, %arg4: memref<32x128xf32, #tpu.memory_space<vmem>>, %arg5: memref<1x128xf32, #tpu.memory_space<vmem>>, %arg6: memref<128x16xf32, #tpu.memory_space<vmem>>, %arg7: memref<1x16xf32, #tpu.memory_space<vmem>>, %arg8: memref<16x128xf32, #tpu.memory_space<vmem>>, %arg9: memref<1x128xf32, #tpu.memory_space<vmem>>, %arg10: memref<128x32xf32, #tpu.memory_space<vmem>>, %arg11: memref<1x32xf32, #tpu.memory_space<vmem>>, %arg12: memref<16x16xf32, #tpu.memory_space<vmem>>, %arg13: memref<16x1xf32, #tpu.memory_space<vmem>>) attributes {dimension_semantics = [#tpu.dimension_semantics<parallel>], iteration_bounds = array<i64: 2>, scalar_prefetch = 0 : i64, scratch_operands = 0 : i64, tpu.core_type = #tpu.core_type<tc>, window_params = [{transform_indices = @transform_0, window_bounds = array<i64: 16, 32>}, {transform_indices = @transform_1, window_bounds = array<i64: 16, 1>}, {transform_indices = @transform_2, window_bounds = array<i64: 16, 16>}, {pipeline_mode = #tpu.pipeline_mode<synchronous>, transform_indices = @transform_3, window_bounds = array<i64: 32, 128>}, {pipeline_mode = #tpu.pipeline_mode<synchronous>, transform_indices = @transform_4, window_bounds = array<i64: 1, 128>}, {pipeline_mode = #tpu.pipeline_mode<synchronous>, transform_indices = @transform_5, window_bounds = array<i64: 128, 16>}, {pipeline_mode = #tpu.pipeline_mode<synchronous>, transform_indices = @transform_6, window_bounds = array<i64: 1, 16>}, {pipeline_mode = #tpu.pipeline_mode<synchronous>, transform_indices = @transform_7, window_bounds = array<i64: 16, 128>}, {pipeline_mode = #tpu.pipeline_mode<synchronous>, transform_indices = @transform_8, window_bounds = array<i64: 1, 128>}, {pipeline_mode = #tpu.pipeline_mode<synchronous>, transform_indices = @transform_9, window_bounds = array<i64: 128, 32>}, {pipeline_mode = #tpu.pipeline_mode<synchronous>, transform_indices = @transform_10, window_bounds = array<i64: 1, 32>}, {transform_indices = @transform_11, window_bounds = array<i64: 16, 16>}, {transform_indices = @transform_12, window_bounds = array<i64: 16, 1>}]} {
    %c0 = arith.constant 0 : index
    %c0_0 = arith.constant 0 : index
    %0 = vector.load %arg1[%c0, %c0_0] : memref<16x32xf32, #tpu.memory_space<vmem>>, vector<16x32xf32>
    %c0_1 = arith.constant 0 : index
    %c0_2 = arith.constant 0 : index
    %1 = vector.load %arg4[%c0_1, %c0_2] : memref<32x128xf32, #tpu.memory_space<vmem>>, vector<32x128xf32>
    %cst = arith.constant dense<0.000000e+00> : vector<16x128xf32>
    %2 = tpu.matmul %0, %1, %cst {dimension_numbers = #tpu.dot_dimension_numbers<[1], [0], [0], [1], [0, 0, 1, 1], [], []>} : vector<16x32xf32>, vector<32x128xf32>, vector<16x128xf32> -> vector<16x128xf32>
    %c0_3 = arith.constant 0 : index
    %c0_4 = arith.constant 0 : index
    %3 = vector.load %arg5[%c0_3, %c0_4] : memref<1x128xf32, #tpu.memory_space<vmem>>, vector<1x128xf32>
    %4 = vector.broadcast %3 : vector<1x128xf32> to vector<16x128xf32>
    %5 = arith.addf %2, %4 : vector<16x128xf32>
    %cst_5 = arith.constant 0.000000e+00 : f32
    %6 = vector.broadcast %cst_5 : f32 to vector<16x128xf32>
    %7 = arith.maximumf %5, %6 : vector<16x128xf32>
    %c0_6 = arith.constant 0 : index
    %c0_7 = arith.constant 0 : index
    %8 = vector.load %arg6[%c0_6, %c0_7] : memref<128x16xf32, #tpu.memory_space<vmem>>, vector<128x16xf32>
    %cst_8 = arith.constant dense<0.000000e+00> : vector<16x16xf32>
    %9 = tpu.matmul %7, %8, %cst_8 {dimension_numbers = #tpu.dot_dimension_numbers<[1], [0], [0], [1], [0, 0, 1, 1], [], []>} : vector<16x128xf32>, vector<128x16xf32>, vector<16x16xf32> -> vector<16x16xf32>
    %c0_9 = arith.constant 0 : index
    %c0_10 = arith.constant 0 : index
    %10 = vector.load %arg7[%c0_9, %c0_10] : memref<1x16xf32, #tpu.memory_space<vmem>>, vector<1x16xf32>
    %11 = vector.broadcast %10 : vector<1x16xf32> to vector<16x16xf32>
    %12 = arith.addf %9, %11 : vector<16x16xf32>
    %13 = arith.mulf %12, %12 : vector<16x16xf32>
    %cst_11 = arith.constant dense<0.000000e+00> : vector<16xf32>
    %14 = vector.multi_reduction <add>, %13, %cst_11 [1] : vector<16x16xf32> to vector<16xf32>
    %15 = vector.shape_cast %14 : vector<16xf32> to vector<16x1xf32>
    %cst_12 = arith.constant 1.000000e-24 : f32
    %16 = vector.broadcast %cst_12 : f32 to vector<16x1xf32>
    %17 = arith.maximumf %15, %16 : vector<16x1xf32>
    %18 = math.rsqrt %17 : vector<16x1xf32>
    %19 = vector.broadcast %18 : vector<16x1xf32> to vector<16x16xf32>
    %20 = arith.mulf %12, %19 : vector<16x16xf32>
    %c0_13 = arith.constant 0 : index
    %c0_14 = arith.constant 0 : index
    %21 = vector.load %arg3[%c0_13, %c0_14] : memref<16x16xf32, #tpu.memory_space<vmem>>, vector<16x16xf32>
    %c0_15 = arith.constant 0 : index
    %c0_16 = arith.constant 0 : index
    %22 = vector.load %arg2[%c0_15, %c0_16] : memref<16x1xf32, #tpu.memory_space<vmem>>, vector<16x1xf32>
    %23 = arith.mulf %21, %20 : vector<16x16xf32>
    %cst_17 = arith.constant dense<0.000000e+00> : vector<16xf32>
    %24 = vector.multi_reduction <add>, %23, %cst_17 [1] : vector<16x16xf32> to vector<16xf32>
    %25 = vector.shape_cast %24 : vector<16xf32> to vector<16x1xf32>
    %26 = vector.broadcast %25 : vector<16x1xf32> to vector<16x16xf32>
    %27 = arith.mulf %26, %20 : vector<16x16xf32>
    %28 = arith.subf %21, %27 : vector<16x16xf32>
    %29 = arith.mulf %28, %28 : vector<16x16xf32>
    %cst_18 = arith.constant dense<0.000000e+00> : vector<16xf32>
    %30 = vector.multi_reduction <add>, %29, %cst_18 [1] : vector<16x16xf32> to vector<16xf32>
    %31 = vector.shape_cast %30 : vector<16xf32> to vector<16x1xf32>
    %cst_19 = arith.constant 1.000000e-24 : f32
    %32 = vector.broadcast %cst_19 : f32 to vector<16x1xf32>
    %33 = arith.maximumf %31, %32 : vector<16x1xf32>
    %34 = math.rsqrt %33 : vector<16x1xf32>
    %35 = vector.broadcast %34 : vector<16x1xf32> to vector<16x16xf32>
    %36 = arith.mulf %28, %35 : vector<16x16xf32>
    %37 = vector.broadcast %22 : vector<16x1xf32> to vector<16x16xf32>
    %38 = arith.mulf %37, %20 : vector<16x16xf32>
    %39 = arith.mulf %22, %22 : vector<16x1xf32>
    %cst_20 = arith.constant 1.000000e+00 : f32
    %40 = vector.broadcast %cst_20 : f32 to vector<16x1xf32>
    %41 = arith.subf %40, %39 : vector<16x1xf32>
    %cst_21 = arith.constant 0.000000e+00 : f32
    %42 = vector.broadcast %cst_21 : f32 to vector<16x1xf32>
    %43 = arith.maximumf %41, %42 : vector<16x1xf32>
    %44 = math.sqrt %43 : vector<16x1xf32>
    %45 = vector.broadcast %44 : vector<16x1xf32> to vector<16x16xf32>
    %46 = arith.mulf %45, %36 : vector<16x16xf32>
    %47 = arith.addf %38, %46 : vector<16x16xf32>
    %c0_22 = arith.constant 0 : index
    %c0_23 = arith.constant 0 : index
    %48 = vector.load %arg12[%c0_22, %c0_23] : memref<16x16xf32, #tpu.memory_space<vmem>>, vector<16x16xf32>
    tpu.vector_store %arg12[%c0_22, %c0_23], %47 {strides = array<i32>} : memref<16x16xf32, #tpu.memory_space<vmem>>, vector<16x16xf32>,
    %c0_24 = arith.constant 0 : index
    %c0_25 = arith.constant 0 : index
    %49 = vector.load %arg8[%c0_24, %c0_25] : memref<16x128xf32, #tpu.memory_space<vmem>>, vector<16x128xf32>
    %cst_26 = arith.constant dense<0.000000e+00> : vector<16x128xf32>
    %50 = tpu.matmul %47, %49, %cst_26 {dimension_numbers = #tpu.dot_dimension_numbers<[1], [0], [0], [1], [0, 0, 1, 1], [], []>} : vector<16x16xf32>, vector<16x128xf32>, vector<16x128xf32> -> vector<16x128xf32>
    %c0_27 = arith.constant 0 : index
    %c0_28 = arith.constant 0 : index
    %51 = vector.load %arg9[%c0_27, %c0_28] : memref<1x128xf32, #tpu.memory_space<vmem>>, vector<1x128xf32>
    %52 = vector.broadcast %51 : vector<1x128xf32> to vector<16x128xf32>
    %53 = arith.addf %50, %52 : vector<16x128xf32>
    %cst_29 = arith.constant 0.000000e+00 : f32
    %54 = vector.broadcast %cst_29 : f32 to vector<16x128xf32>
    %55 = arith.maximumf %53, %54 : vector<16x128xf32>
    %c0_30 = arith.constant 0 : index
    %c0_31 = arith.constant 0 : index
    %56 = vector.load %arg10[%c0_30, %c0_31] : memref<128x32xf32, #tpu.memory_space<vmem>>, vector<128x32xf32>
    %cst_32 = arith.constant dense<0.000000e+00> : vector<16x32xf32>
    %57 = tpu.matmul %55, %56, %cst_32 {dimension_numbers = #tpu.dot_dimension_numbers<[1], [0], [0], [1], [0, 0, 1, 1], [], []>} : vector<16x128xf32>, vector<128x32xf32>, vector<16x32xf32> -> vector<16x32xf32>
    %c0_33 = arith.constant 0 : index
    %c0_34 = arith.constant 0 : index
    %58 = vector.load %arg11[%c0_33, %c0_34] : memref<1x32xf32, #tpu.memory_space<vmem>>, vector<1x32xf32>
    %59 = vector.broadcast %58 : vector<1x32xf32> to vector<16x32xf32>
    %60 = arith.addf %57, %59 : vector<16x32xf32>
    %61 = arith.negf %60 : vector<16x32xf32>
    %62 = math.exp %61 : vector<16x32xf32>
    %cst_35 = arith.constant 1.000000e+00 : f32
    %63 = vector.broadcast %cst_35 : f32 to vector<16x32xf32>
    %64 = arith.addf %63, %62 : vector<16x32xf32>
    %65 = arith.divf %63, %64 : vector<16x32xf32>
    %66 = arith.subf %65, %0 : vector<16x32xf32>
    %67 = arith.mulf %66, %66 : vector<16x32xf32>
    %cst_36 = arith.constant dense<0.000000e+00> : vector<16xf32>
    %68 = vector.multi_reduction <add>, %67, %cst_36 [1] : vector<16x32xf32> to vector<16xf32>
    %69 = vector.shape_cast %68 : vector<16xf32> to vector<16x1xf32>
    %c0_37 = arith.constant 0 : index
    %c0_38 = arith.constant 0 : index
    %70 = vector.load %arg13[%c0_37, %c0_38] : memref<16x1xf32, #tpu.memory_space<vmem>>, vector<16x1xf32>
    tpu.vector_store %arg13[%c0_37, %c0_38], %69 {strides = array<i32>} : memref<16x1xf32, #tpu.memory_space<vmem>>, vector<16x1xf32>,
    return
  }
  func.func @transform_0(%arg0: i32) -> (i32, i32) {
    %c0_i32 = arith.constant 0 : i32
    %c0_i32_0 = arith.constant 0 : i32
    return %arg0, %c0_i32 : i32, i32
  }
  func.func @transform_1(%arg0: i32) -> (i32, i32) {
    %c0_i32 = arith.constant 0 : i32
    %c0_i32_0 = arith.constant 0 : i32
    return %arg0, %c0_i32 : i32, i32
  }
  func.func @transform_2(%arg0: i32) -> (i32, i32) {
    %c0_i32 = arith.constant 0 : i32
    %c0_i32_0 = arith.constant 0 : i32
    return %arg0, %c0_i32 : i32, i32
  }
  func.func @transform_3(%arg0: i32) -> (i32, i32) {
    %c0_i32 = arith.constant 0 : i32
    %c0_i32_0 = arith.constant 0 : i32
    %c0_i32_1 = arith.constant 0 : i32
    return %c0_i32, %c0_i32_0 : i32, i32
  }
  func.func @transform_4(%arg0: i32) -> (i32, i32) {
    %c0_i32 = arith.constant 0 : i32
    %c0_i32_0 = arith.constant 0 : i32
    %c0_i32_1 = arith.constant 0 : i32
    return %c0_i32, %c0_i32_0 : i32, i32
  }
  func.func @transform_5(%arg0: i32) -> (i32, i32) {
    %c0_i32 = arith.constant 0 : i32
    %c0_i32_0 = arith.constant 0 : i32
    %c0_i32_1 = arith.constant 0 : i32
    return %c0_i32, %c0_i32_0 : i32, i32
  }
  func.func @transform_6(%arg0: i32) -> (i32, i32) {
    %c0_i32 = arith.constant 0 : i32
    %c0_i32_0 = arith.constant 0 : i32
    %c0_i32_1 = arith.constant 0 : i32
    return %c0_i32, %c0_i32_0 : i32, i32
  }
  func.func @transform_7(%arg0: i32) -> (i32, i32) {
    %c0_i32 = arith.constant 0 : i32
    %c0_i32_0 = arith.constant 0 : i32
    %c0_i32_1 = arith.constant 0 : i32
    return %c0_i32, %c0_i32_0 : i32, i32
  }
  func.func @transform_8(%arg0: i32) -> (i32, i32) {
    %c0_i32 = arith.constant 0 : i32
    %c0_i32_0 = arith.constant 0 : i32
    %c0_i32_1 = arith.constant 0 : i32
    return %c0_i32, %c0_i32_0 : i32, i32
  }
  func.func @transform_9(%arg0: i32) -> (i32, i32) {
    %c0_i32 = arith.constant 0 : i32
    %c0_i32_0 = arith.constant 0 : i32
    %c0_i32_1 = arith.constant 0 : i32
    return %c0_i32, %c0_i32_0 : i32, i32
  }
  func.func @transform_10(%arg0: i32) -> (i32, i32) {
    %c0_i32 = arith.constant 0 : i32
    %c0_i32_0 = arith.constant 0 : i32
    %c0_i32_1 = arith.constant 0 : i32
    return %c0_i32, %c0_i32_0 : i32, i32
  }
  func.func @transform_11(%arg0: i32) -> (i32, i32) {
    %c0_i32 = arith.constant 0 : i32
    %c0_i32_0 = arith.constant 0 : i32
    return %arg0, %c0_i32 : i32, i32
  }
  func.func @transform_12(%arg0: i32) -> (i32, i32) {
    %c0_i32 = arith.constant 0 : i32
    %c0_i32_0 = arith.constant 0 : i32
    return %arg0, %c0_i32 : i32, i32
  }
}

</mosaic_0001>

<bundles_post_ra>
// kernel: model_forward.1
= control target key start
LH: loop header
LB: loop body
LE: loop exit
PB: predicated region body
PF: predicated region fallthrough
CT: control target
= control target key end

     0   :  { %s2179_s0 = inlined_call_operand.vmem [shape: f32[32,32], index: 0, kind: input, shape index: {}]   ;;  %s2180_s1 = inlined_call_operand.vmem [shape: f32[32,1], index: 1, kind: input, shape index: {}]   ;;  %s2181_s2 = inlined_call_operand.vmem [shape: f32[32,16], index: 2, kind: input, shape index: {}]   ;;  %s2182_s3 = inlined_call_operand.hbm [shape: f32[32,128], index: 3, kind: input, shape index: {}]   ;;  %s2183_s4 = inlined_call_operand.hbm [shape: f32[1,128], index: 4, kind: input, shape index: {}]   ;;  %s2184_s5 = inlined_call_operand.vmem [shape: f32[128,16], index: 5, kind: input, shape index: {}]   ;;  %s2185_s6 = inlined_call_operand.hbm [shape: f32[1,16], index: 6, kind: input, shape index: {}]   ;;  %s2186_s7 = inlined_call_operand.hbm [shape: f32[16,128], index: 7, kind: input, shape index: {}]   ;;  %s2187_s8 = inlined_call_operand.hbm [shape: f32[1,128], index: 8, kind: input, shape index: {}]   ;;  %s2188_s9 = inlined_call_operand.vmem [shape: f32[128,32], index: 9, kind: input, shape index: {}]   ;;  %s2189_s10 = inlined_call_operand.hbm [shape: f32[1,32], index: 10, kind: input, shape index: {}]   ;;  %s2190_s11 = inlined_call_operand.vmem [shape: f32[32,16], index: 11, kind: output, shape index: {0}]   ;;  %s2191_s12 = inlined_call_operand.vmem [shape: f32[32,1], index: 12, kind: output, shape index: {1}]  }
   0x1   :  { %2196 = sst [smem:[#allocation16_spill]] %s2183_s4 }
   0x2   :  { %18 = vsyncpa [#allocation3], 0 }
   0x3   :  { %19 = vsyncpa [#allocation5], 0 }
   0x4   :  { %20 = vsyncpa [#allocation8], 0 }
   0x5   :  { %21 = vsyncpa [#allocation11], 0  ;;  %s1841_s21 = smov 0  }
   0x6 LB: > { %s1767_s22 = smov [#allocation4]   ;;  %s2192_s24 = sadd.s32 4294967295, %s1765_s21   ;;  %s1765_s21 = sphi %s1841_s21, %s27_s21  }
   0x7   : > { %s356_s23 = sshll.u32 %s1767_s22, 4  ;;  %p1234_p0 = scmp.ge.s32.totalorder %s1765_s21, 1  ;;  %s1855_s23 = int_to_ptr.vmem [resolvable:$true] %s356_s23 }
   0x8   : > { %p330_p1 = scmp.lt.s32.totalorder %s1765_s21, 3  ;;  %p1851_p2 = scmp.eq.s32.totalorder %s2192_s24, 0 }
   0x9   : > { %s1768_s27 = smov [#allocation7]   ;;  %s1769_s30 = smov [#allocation2]  }
   0xa   : > { %s2197_s25 = scalar_select %p1851_p2, 1, 0 }
   0xb   : > { %p1857_p3 = pnand %p1234_p0, %p330_p1  ;;  %s380_s28 = sshll.u32 %s1768_s27, 4  ;;  %s1863_s28 = int_to_ptr.vmem [resolvable:$true] %s380_s28 }
   0xc   : > { %s342_s13 = sshll.u32 %s1769_s30, 4  ;;  %s1770_s14 = smov [#allocation6]   ;;  %s1871_s13 = int_to_ptr.vmem [resolvable:$true] %s342_s13 }
   0xd   : > { %s2198_s26 = scalar_select %p1857_p3, 1, 0 }
   0xe   : > { %p1505_p4 = pneg %p1857_p3  ;;  %s1873_s15 = sshll.u32 %s1770_s14, 4  ;;  %s371_s15 = int_to_ptr.vmem [resolvable:$true] %s1873_s15 }
   0xf   : > { %s2200_s4 = sld [smem:[#allocation16_spill]] }
  0x10   : > { %p1867_p5 = pnand %p1851_p2, %p1505_p4 }
  0x12   : > { %p1883_p7 = pneg %p1867_p5 }
  0x15   : > { %s1575_s18 = scalar_lea.hbm %s2200_s4, 16 }
  0x16   : > { %p1576_p6 = scmp.ne.s32.totalorder %s2200_s4, %s1575_s18  ;;  %p1582_p10 = scmp.lt.u32.totalorder %s1575_s18, %s2200_s4 }
  0x18   : > { %p1578_p8 = pnand %p1883_p7, %p1576_p6 }
  0x1a   : > { %p1579_p9 = pneg %p1578_p8 }
  0x1c   : > { %p1584_p11 = pnand %p1582_p10, %p1579_p9 }
  0x1e   : > { %1587 = shalt.err (!%p1584_p11)
}
  0x1f   : > { %s1588_s14 = scalar_lea.vmem %s1855_s23, 16  ;;  %s1595_s16 = scalar_lea.vmem %s1855_s23, 32 }
  0x20   : > { %p1589_p12 = scmp.ne.s32.totalorder %s1855_s23, %s1588_s14  ;;  %p1596_p1 = scmp.lt.s32.totalorder %s1855_s23, %s1855_s23 }
  0x21   : > { %p1597_p4 = scmp.lt.s32.totalorder %s1595_s16, %s1588_s14 }
  0x22   : > { %p1591_p13 = pnand %p1589_p12, %p1883_p7 }
  0x23   : > { %p1598_p6 = por %p1597_p4, %p1596_p1 }
  0x24   : > { %p1592_p0 = pneg %p1591_p13 }
  0x26   : > { %p1599_p8 = pnand %p1598_p6, %p1592_p0 }
  0x28   : > { %1602 = shalt.err (!%p1599_p8)
}
  0x29   : > { %1511 = dma.hbm_to_vmem [thread:$0]  (!%p1867_p5), %s2200_s4, 16, %s1855_s23, [#allocation5]  }
  0x2a   : > { %s1603_s27 = scalar_lea.hbm %s2186_s7, 256 }
  0x2b   : > { %p1604_p9 = scmp.ne.s32.totalorder %s2186_s7, %s1603_s27  ;;  %p1610_p12 = scmp.lt.u32.totalorder %s1603_s27, %s2186_s7 }
  0x2d   : > { %p1606_p10 = pnand %p1604_p9, %p1883_p7 }
  0x2f   : > { %p1607_p11 = pneg %p1606_p10 }
  0x31   : > { %p1612_p13 = pnand %p1610_p12, %p1607_p11 }
  0x33   : > { %1615 = shalt.err (!%p1612_p13)
}
  0x34   : > { %s1616_s23 = scalar_lea.vmem %s1863_s28, 256  ;;  %p1624_p6 = scmp.lt.s32.totalorder %s1863_s28, %s1863_s28 }
  0x35   : > { %p1617_p0 = scmp.ne.s32.totalorder %s1863_s28, %s1616_s23  ;;  %p1625_p8 = scmp.lt.s32.totalorder %s1616_s23, %s1616_s23 }
  0x37   : > { %p1619_p1 = pnand %p1617_p0, %p1883_p7  ;;  %p1626_p9 = por %p1625_p8, %p1624_p6 }
  0x39   : > { %p1620_p4 = pneg %p1619_p1 }
  0x3b   : > { %p1627_p10 = pnand %p1626_p9, %p1620_p4 }
  0x3d   : > { %1630 = shalt.err (!%p1627_p10)
}
  0x3e   : > { %s1771_s24 = smov 128   ;;  %s1772_s17 = smov 8  }
  0x3f   : > { %1517 = dma.hbm_to_vmem [thread:$0]  (!%p1867_p5), %s2186_s7, 256, %s1863_s28, [#allocation8], %s1771_s24, %s1771_s24, %s1772_s17  }
  0x40   : > { %s1631_s30 = scalar_lea.hbm %s2182_s3, 512 }
  0x41   : > { %p1632_p11 = scmp.ne.s32.totalorder %s2182_s3, %s1631_s30  ;;  %p1638_p0 = scmp.lt.u32.totalorder %s1631_s30, %s2182_s3 }
  0x43   : > { %p1634_p12 = pnand %p1632_p11, %p1883_p7 }
  0x45   : > { %p1635_p13 = pneg %p1634_p12 }
  0x47   : > { %p1640_p1 = pnand %p1638_p0, %p1635_p13 }
  0x49   : > { %1643 = shalt.err (!%p1640_p1)
}
  0x4a   : > { %s1644_s28 = scalar_lea.vmem %s1871_s13, 512  ;;  %p1652_p9 = scmp.lt.s32.totalorder %s1871_s13, %s1871_s13 }
  0x4b   : > { %p1645_p4 = scmp.ne.s32.totalorder %s1871_s13, %s1644_s28  ;;  %p1653_p10 = scmp.lt.s32.totalorder %s1644_s28, %s1644_s28 }
  0x4d   : > { %p1647_p6 = pnand %p1645_p4, %p1883_p7  ;;  %p1654_p11 = por %p1653_p10, %p1652_p9 }
  0x4f   : > { %p1648_p8 = pneg %p1647_p6 }
  0x51   : > { %p1655_p12 = pnand %p1654_p11, %p1648_p8 }
  0x53   : > { %1658 = shalt.err (!%p1655_p12)
}
  0x54   : > { %1508 = dma.hbm_to_vmem [thread:$0]  (!%p1867_p5), %s2182_s3, 512, %s1871_s13, [#allocation3], %s1771_s24, %s1771_s24, %s1772_s17  }
  0x55   : > { %s1659_s27 = scalar_lea.hbm %s2185_s6, 16 }
  0x56   : > { %p1660_p13 = scmp.ne.s32.totalorder %s2185_s6, %s1659_s27  ;;  %p1666_p4 = scmp.lt.u32.totalorder %s1659_s27, %s2185_s6 }
  0x58   : > { %p1662_p0 = pnand %p1660_p13, %p1883_p7 }
  0x5a   : > { %p1663_p1 = pneg %p1662_p0 }
  0x5c   : > { %p1668_p6 = pnand %p1666_p4, %p1663_p1 }
  0x5e   : > { %1671 = shalt.err (!%p1668_p6)
}
  0x5f   : > { %s1672_s28 = scalar_lea.vmem %s371_s15, 16  ;;  %s1679_s13 = scalar_lea.vmem %s371_s15, 32 }
  0x60   : > { %p1673_p8 = scmp.ne.s32.totalorder %s371_s15, %s1672_s28  ;;  %p1680_p11 = scmp.lt.s32.totalorder %s371_s15, %s371_s15 }
  0x61   : > { %p1681_p12 = scmp.lt.s32.totalorder %s1679_s13, %s1672_s28 }
  0x62   : > { %p1675_p9 = pnand %p1673_p8, %p1883_p7 }
  0x63   : > { %p1682_p2 = por %p1681_p12, %p1680_p11 }
  0x64   : > { %p1676_p10 = pneg %p1675_p9 }
  0x66   : > { %p1683_p3 = pnand %p1682_p2, %p1676_p10 }
  0x68   : > { %1686 = shalt.err (!%p1683_p3)
}
  0x69   : > { %1514 = dma.hbm_to_vmem [thread:$0]  (!%p1867_p5), %s2185_s6, 16, %s371_s15, [#allocation5]  }
  0x6a   : > { %s1773_s4 = smov [#allocation9]   ;;  %s1774_s19 = smov [#allocation10]  }
  0x6b   : > { %s394_s18 = sshll.u32 %s1773_s4, 4  ;;  %s408_s20 = sshll.u32 %s1774_s19, 4  ;;  %s395_s18 = int_to_ptr.vmem [resolvable:$true] %s394_s18  ;;  %s409_s20 = int_to_ptr.vmem [resolvable:$true] %s408_s20 }
  0x6c   : > { %s1687_s14 = scalar_lea.hbm %s2187_s8, 16 }
  0x6d   : > { %p1688_p2 = scmp.ne.s32.totalorder %s2187_s8, %s1687_s14  ;;  %p1694_p0 = scmp.lt.u32.totalorder %s1687_s14, %s2187_s8 }
  0x6f   : > { %p1690_p3 = pnand %p1688_p2, %p1883_p7 }
  0x71   : > { %p1691_p13 = pneg %p1690_p3 }
  0x73   : > { %p1696_p1 = pnand %p1694_p0, %p1691_p13 }
  0x75   : > { %1699 = shalt.err (!%p1696_p1)
}
  0x76   : > { %s1700_s15 = scalar_lea.vmem %s395_s18, 16  ;;  %s1707_s24 = scalar_lea.vmem %s395_s18, 32 }
  0x77   : > { %p1701_p4 = scmp.ne.s32.totalorder %s395_s18, %s1700_s15  ;;  %p1708_p9 = scmp.lt.s32.totalorder %s395_s18, %s395_s18 }
  0x78   : > { %p1709_p10 = scmp.lt.s32.totalorder %s1707_s24, %s1700_s15 }
  0x79   : > { %p1703_p6 = pnand %p1701_p4, %p1883_p7 }
  0x7a   : > { %p1710_p11 = por %p1709_p10, %p1708_p9 }
  0x7b   : > { %p1704_p8 = pneg %p1703_p6 }
  0x7d   : > { %p1711_p12 = pnand %p1710_p11, %p1704_p8 }
  0x7f   : > { %1714 = shalt.err (!%p1711_p12)
}
  0x80   : > { %1520 = dma.hbm_to_vmem [thread:$0]  (!%p1867_p5), %s2187_s8, 16, %s395_s18, [#allocation8]  }
  0x81   : > { %s1715_s30 = scalar_lea.hbm %s2189_s10, 16 }
  0x82   : > { %p1716_p2 = scmp.ne.s32.totalorder %s2189_s10, %s1715_s30  ;;  %p1722_p0 = scmp.lt.u32.totalorder %s1715_s30, %s2189_s10 }
  0x84   : > { %p1718_p3 = pnand %p1716_p2, %p1883_p7 }
  0x86   : > { %p1719_p13 = pneg %p1718_p3 }
  0x88   : > { %p1724_p1 = pnand %p1722_p0, %p1719_p13 }
  0x8a   : > { %1727 = shalt.err (!%p1724_p1)
}
  0x8b   : > { %s1728_s13 = scalar_lea.vmem %s409_s20, 16  ;;  %s1735_s18 = scalar_lea.vmem %s409_s20, 32 }
  0x8c   : > { %p1729_p4 = scmp.ne.s32.totalorder %s409_s20, %s1728_s13  ;;  %p1736_p9 = scmp.lt.s32.totalorder %s409_s20, %s409_s20 }
  0x8d   : > { %p1737_p10 = scmp.lt.s32.totalorder %s1735_s18, %s1728_s13 }
  0x8e   : > { %p1731_p6 = pnand %p1729_p4, %p1883_p7 }
  0x8f   : > { %p1738_p11 = por %p1737_p10, %p1736_p9 }
  0x90   : > { %p1732_p8 = pneg %p1731_p6 }
  0x92   : > { %p1739_p12 = pnand %p1738_p11, %p1732_p8 }
  0x94   : > { %1742 = shalt.err (!%p1739_p12)
}
  0x95   : > { %1523 = dma.hbm_to_vmem [thread:$0]  (!%p1867_p5), %s2189_s10, 16, %s409_s20, [#allocation11]  }
  0x96   : > { %p2202_p2 = scmp.ne.s32.totalorder %s2198_s26, 0 }
  0x97   : > { %p2203_p3 = scmp.ne.s32.totalorder (!%p2202_p2), %s2197_s25, 0 }
  0x98   : > { %448 = sbr.rel (%p2202_p2) target bundleno = 1694 (0x69e), region = 64 }
  0x9f   : > { %1748 = dma.done.wait (%p2203_p3), [#allocation3], 512  }
  0xa0   : > { %1750 = vsyncadd (%p2203_p3), [#allocation3], 4294966784 }
  0xa1   : > { %1752 = dma.done.wait (%p2203_p3), [#allocation5], 32  }
  0xa2   : > { %1754 = vsyncadd (%p2203_p3), [#allocation5], 4294967264 }
  0xa3   : > { %1756 = dma.done.wait (%p2203_p3), [#allocation8], 272  }
  0xa4   : > { %1758 = vsyncadd (%p2203_p3), [#allocation8], 4294967024 }
  0xa5   : > { %1760 = dma.done.wait (%p2203_p3), [#allocation11], 16  }
  0xa6   : > { %1762 = vsyncadd (%p2203_p3), [#allocation11], 4294967280  ;;  %s2204_s26 = sadd.s32 4294967295, %s1765_s21   ;;  %vm568_vm0 = vcmask 261120   ;;  %v557_v0 = vld [vmem:[#allocation2] sm:$0xff]  ;;  %v558_v1 = vld [vmem:[#allocation2 + $0x8] sm:$0xff] }
  0xa7   : > { %s1249_s29 = sshll.u32 %s2204_s26, 1  ;;  %v559_v2 = vld [vmem:[#allocation2 + $0x10] sm:$0xff]  ;;  %v1405_v3 = vpack.c.bf16 %v558_v1, %v557_v0  ;;  %v560_v4 = vld [vmem:[#allocation2 + $0x18] sm:$0xff]  ;;  %v652_v7 = vld [vmem:[%s2184_s5] sm:$0xff]  ;;  %vm752_vm1 = vcmask 130048   ;;  %v1775_v62 = vmov 0  }
  0xa8   : > { %p526_p5 = scmp.lt.s32.totalorder %s1249_s29, 3  ;;  %v1409_v6 = vpack.c.bf16 %v560_v4, %v559_v2  ;;  %v653_v8 = vld [vmem:[%s2184_s5 + $0x8] sm:$0xff]  ;;  %v654_v10 = vld [vmem:[%s2184_s5 + $0x10] sm:$0xff]  ;;  %v655_v11 = vld [vmem:[%s2184_s5 + $0x18] sm:$0xff]  ;;  %1554 = vset.pattern.permute.xlu1 %v1775_v62  ;;  %1553 = vset.pattern.permute.xlu0 %v1775_v62  ;;  %vm1055_vm6 = vcmask 7168  }
  0xa9   : > { %1406 = vmatprep.subr.bf16.mxu1 %v1405_v3  ;;  %v1413_v9 = vpack.c.bf16 %v653_v8, %v652_v7  ;;  %v1417_v13 = vpack.c.bf16 %v655_v11, %v654_v10  ;;  %v656_v14 = vld [vmem:[%s2184_s5 + $0x20] sm:$0xff]  ;;  %v657_v15 = vld [vmem:[%s2184_s5 + $0x28] sm:$0xff]  ;;  %v658_v17 = vld [vmem:[%s2184_s5 + $0x30] sm:$0xff] }
  0xaa   : > { %s2206_s29 = smov (!%p526_p5, %s1249_s29), 3  ;;  %1408 = vmatpush3.bf16.msra.mxu1 %v1405_v3  ;;  %v1421_v16 = vpack.c.bf16 %v657_v15, %v656_v14  ;;  %v659_v18 = vld [vmem:[%s2184_s5 + $0x38] sm:$0xff]  ;;  %v660_v20 = vld [vmem:[%s2184_s5 + $0x40] sm:$0xff]  ;;  %v661_v21 = vld [vmem:[%s2184_s5 + $0x48] sm:$0xff] }
  0xab   : > { %s2026_s22 = sshll.u32 %s2206_s29, 3  ;;  %1410 = vmatprep.subr.bf16.mxu1 %v1409_v6  ;;  %v1425_v19 = vpack.c.bf16 %v659_v18, %v658_v17  ;;  %v1429_v22 = vpack.c.bf16 %v661_v21, %v660_v20  ;;  %v662_v23 = vld [vmem:[%s2184_s5 + $0x50] sm:$0xff]  ;;  %v663_v24 = vld [vmem:[%s2184_s5 + $0x58] sm:$0xff]  ;;  %v664_v26 = vld [vmem:[%s2184_s5 + $0x60] sm:$0xff] }
  0xac   : > { %s529_s4 = scalar_lea.vmem %s2179_s0, %s2026_s22  ;;  %v1433_v25 = vpack.c.bf16 %v663_v24, %v662_v23  ;;  %v665_v27 = vld [vmem:[%s2184_s5 + $0x68] sm:$0xff]  ;;  %v666_v29 = vld [vmem:[%s2184_s5 + $0x70] sm:$0xff]  ;;  %v667_v30 = vld [vmem:[%s2184_s5 + $0x78] sm:$0xff]  ;;  %s541_s25 = scalar_lea.vmem %s2181_s2, %s2026_s22 }
  0xad   : > { %v2032_v5 = vld [vmem:[%s529_s4] sm:$0xff]  ;;  %v2048_v12 = vld [vmem:[%s529_s4 + $0x8] sm:$0xff]  ;;  %v1437_v28 = vpack.c.bf16 %v665_v27, %v664_v26  ;;  %v1441_v31 = vpack.c.bf16 %v667_v30, %v666_v29  ;;  %s535_s30 = scalar_lea.vmem %s2180_s1, %s2026_s22  ;;  %s547_s15 = scalar_lea.vmem %s2190_s11, %s2026_s22 }
  0xae   : > { %1325 = vmatprep.mubr.msk.f32.mxu1 %vm568_vm0, %v2032_v5  ;;  %1412 = vmatpush3.bf16.msra.mxu1 %v1409_v6  ;;  %v1259_v32 = vld [vmem:[#allocation4] ss:$0 sm:$0xff]  ;;  %v1262_v39 = vld [vmem:[#allocation6] ss:$0 sm:$0xff]  ;;  %v766_v57 = vld [vmem:[%s541_s25 + $0x8] sm:$0xff]  ;;  %s553_s28 = scalar_lea.vmem %s2191_s12, %s2026_s22 }
  0xaf   : > { %1414 = vmatprep.subr.bf16.mxu1 %v1413_v9  ;;  %v765_v53 = vld [vmem:[%s541_s25] sm:$0xff]  ;;  %v768_v2 = vld [vmem:[%s535_s30 + $0x8] sm:$0xff] }
  0xb0   : > { %v767_v63 = vld [vmem:[%s535_s30] sm:$0xff]  ;;  %v808_v7 = vmul.f32 %v768_v2, %v768_v2  ;;  %v844_v30 = vld [vmem:[#allocation7 + $0x8] sm:$0xff] }
  0xb1   : > { %1326 = vmatmul.mubr.msk.f32.vlgmr.msra.gmra.mrb[0].mxu1 %vm568_vm0, %v2048_v12  ;;  %v807_v0 = vmul.f32 %v767_v63, %v767_v63  ;;  %v843_v29 = vld [vmem:[#allocation7] sm:$0xff] }
  0xb2   : > { %1416 = vmatpush3.bf16.msra.mxu1 %v1413_v9  ;;  %v943_v62 = vld [vmem:[%s2188_s9 + $0x40] sm:$0xff] }
  0xb3   : > { %1418 = vmatprep.subr.bf16.mxu1 %v1417_v13  ;;  %v809_v1 = vsub.f32 1.0, %v807_v0 }
  0xb5   : > { %v811_v6 = vmax.f32 %v809_v1, 0.0  ;;  %v945_v1 = vld [vmem:[%s2188_s9 + $0x50] sm:$0xff] }
  0xb6   : > { %1420 = vmatpush3.bf16.msra.mxu1 %v1417_v13  ;;  %v810_v13 = vsub.f32 1.0, %v808_v7 }
  0xb7   : > { %1422 = vmatprep.subr.bf16.mxu1 %v1421_v16  ;;  %vm815_vm2 = vcmp.eq.f32.partialorder %v811_v6, inf  ;;  %v818_v21 = vand.u32 2147483648, %v811_v6  ;;  %vm817_vm3 = vcmp.eq.f32.partialorder %v811_v6, 0.0 }
  0xb8   : > { %v812_v17 = vmax.f32 %v810_v13, 0.0 }
  0xba   : > { %1424 = vmatpush3.bf16.msra.mxu1 %v1421_v16  ;;  %vm822_vm4 = vcmp.eq.f32.partialorder %v812_v17, inf  ;;  %v825_v26 = vand.u32 2147483648, %v812_v17  ;;  %vm824_vm5 = vcmp.eq.f32.partialorder %v812_v17, 0.0 }
  0xbb   : > { %1426 = vmatprep.subr.bf16.mxu1 %v1425_v19 }
  0xbe   : > { %1428 = vmatpush3.bf16.msra.mxu1 %v1425_v19 }
  0xbf   : > { %1430 = vmatprep.subr.bf16.mxu1 %v1429_v22 }
  0xc2   : > { %1432 = vmatpush3.bf16.msra.mxu1 %v1429_v22 }
  0xc3   : > { %1434 = vmatprep.subr.bf16.mxu1 %v1433_v25 }
  0xc6   : > { %1436 = vmatpush3.bf16.msra.mxu1 %v1433_v25 }
  0xc7   : > { %1438 = vmatprep.subr.bf16.mxu1 %v1437_v28 }
  0xca   : > { %1440 = vmatpush3.bf16.msra.mxu1 %v1437_v28 }
  0xcb   : > { %1442 = vmatprep.subr.bf16.mxu1 %v1441_v31 }
  0xce   : > { %1444 = vmatpush3.bf16.msra.mxu1 %v1441_v31  ;;  %v1445_v31 = vpack.c.bf16 %v844_v30, %v843_v29 }
  0xd0   : > { %1446 = vmatprep.subr.bf16.mxu0 %v1445_v31 }
  0xd1   : > { %1448 = vmatpush3.bf16.msra.mxu0 %v1445_v31 }
 0x184   : > { %v1327_v33 = vpop.f32.mrb[0].mxu1 }
 0x185   : > { %v647_v34 = vadd.f32 %v1327_v33, %v1259_v32  ;;  %v641_v35 = vpop.f32.mrb[1].mxu1  ;;  %v936_v33 = vld [vmem:[%s2188_s9 + $0x8] sm:$0xff] }
 0x186   : > { %v642_v36 = vadd.f32 %v1259_v32, %v641_v35  ;;  %v935_v32 = vld [vmem:[%s2188_s9] sm:$0xff] }
 0x187   : > { %v651_v38 = vmax.f32 %v647_v34, 0.0  ;;  %v1449_v34 = vpack.c.bf16 %v936_v33, %v935_v32 }
 0x188   : > { %v650_v37 = vmax.f32 %v642_v36, 0.0 }
 0x189   : > { %1450 = vmatprep.subr.bf16.mxu0 %v1449_v34 }
 0x18a   : > { %1360 = vmatprep.mubr.f32.mxu1 %v650_v37 }
 0x18b   : > { %1361 = vmatmul.mubr.f32.vlgmr.msra.gmra.mrb[2].mxu1 %v651_v38 }
 0x25e   : > { %v1362_v40 = vpop.f32.mrb[2].mxu1 }
 0x25f   : > { %v741_v41 = vpop.f32.mrb[3].mxu1  ;;  %v747_v42 = vadd.f32 %v1362_v40, %v1262_v39 }
 0x260   : > { %v742_v43 = vadd.f32 %v1262_v39, %v741_v41 }
 0x261   : > { %v751_v46 = vmul.f32 %v747_v42, %v747_v42 }
 0x262   : > { %v750_v44 = vmul.f32 %v742_v43, %v742_v43 }
 0x263   : > { %v756_v47 = vsel %vm752_vm1, %v751_v46, 0.0 }
 0x264   : > { %v753_v45 = vsel %vm752_vm1, %v750_v44, 0.0 }
 0x265   : > { %754 = vadd.xlane.f32.xlu0 %v753_v45 }
 0x269   : > { %757 = vadd.xlane.f32.xlu0 %v756_v47 }
 0x2f2   : > { %v755_v48 = vpop.xlane.xlu0 %754 }
 0x2f3   : > { %v759_v49 = vmax.f32 %v755_v48, 1e-24 }
 0x2f5   : > { %1555 = vrsqrt.f32 %v759_v49 }
 0x2f6   : > { %v758_v50 = vpop.xlane.xlu0 %757 }
 0x2f7   : > { %v760_v51 = vmax.f32 %v758_v50, 1e-24  ;;  %v937_v50 = vld [vmem:[%s2188_s9 + $0x10] sm:$0xff] }
 0x2f9   : > { %1557 = vrsqrt.f32 %v760_v51  ;;  %v938_v51 = vld [vmem:[%s2188_s9 + $0x18] sm:$0xff] }
 0x2fa   : > { %1559 = vrsqrt.f32 %v811_v6 }
 0x2fb   : > { %1561 = vrsqrt.f32 %v812_v17 }
 0x2ff   : > { %v1556_v52 = vpop.eup %1555 }
 0x300   : > { %v2094_v54 = vmul.f32 %v1556_v52, %v742_v43 }
 0x302   : > { %v769_v55 = vmul.f32 %v765_v53, %v2094_v54 }
 0x303   : > { %v1558_v56 = vpop.eup %1557 }
 0x304   : > { %v771_v58 = vsel %vm752_vm1, %v769_v55, 0.0  ;;  %v2098_v59 = vmul.f32 %v1558_v56, %v747_v42  ;;  %v1560_v19 = vpop.eup %1559  ;;  %v1453_v55 = vpack.c.bf16 %v938_v51, %v937_v50  ;;  %v939_v56 = vld [vmem:[%s2188_s9 + $0x20] sm:$0xff] }
 0x305   : > { %772 = vadd.xlane.f32.xlu1 %v771_v58  ;;  %v814_v20 = vmul.f32 %v1560_v19, %v811_v6  ;;  %v1562_v23 = vpop.eup %1561  ;;  %v1266_v19 = vld [vmem:[#allocation10] ss:$0 sm:$0xff] }
 0x306   : > { %v770_v60 = vmul.f32 %v766_v57, %v2098_v59  ;;  %v821_v25 = vmul.f32 %v1562_v23, %v812_v17 }
 0x307   : > { %v816_v22 = vsel %vm815_vm2, %v811_v6, %v814_v20  ;;  %v948_v6 = vld [vmem:[%s2188_s9 + $0x68] sm:$0xff] }
 0x308   : > { %v774_v61 = vsel %vm752_vm1, %v770_v60, 0.0  ;;  %v819_v24 = vsel %vm817_vm3, %v818_v21, %v816_v22  ;;  %v823_v27 = vsel %vm822_vm4, %v812_v17, %v821_v25  ;;  %v942_v60 = vld [vmem:[%s2188_s9 + $0x38] sm:$0xff] }
 0x309   : > { %775 = vadd.xlane.f32.xlu1 %v774_v61  ;;  %v826_v28 = vsel %vm824_vm5, %v825_v26, %v823_v27 }
 0x392   : > { %v773_v3 = vpop.xlane.xlu1 %772 }
 0x393   : > { %v777_v4 = vmul.f32 %v773_v3, %v2094_v54 }
 0x395   : > { %v779_v8 = vsub.f32 %v765_v53, %v777_v4  ;;  %v947_v4 = vld [vmem:[%s2188_s9 + $0x60] sm:$0xff] }
 0x396   : > { %v776_v9 = vpop.xlane.xlu1 %775  ;;  %v1473_v7 = vpack.c.bf16 %v948_v6, %v947_v4 }
 0x397   : > { %v778_v10 = vmul.f32 %v776_v9, %v2098_v59  ;;  %v781_v11 = vmul.f32 %v779_v8, %v779_v8  ;;  %v950_v9 = vld [vmem:[%s2188_s9 + $0x78] sm:$0xff] }
 0x399   : > { %v780_v14 = vsub.f32 %v766_v57, %v778_v10  ;;  %v783_v15 = vsel %vm752_vm1, %v781_v11, 0.0  ;;  %v940_v57 = vld [vmem:[%s2188_s9 + $0x28] sm:$0xff]  ;;  %v1263_v11 = vld [vmem:[#allocation9] ss:$0 sm:$0xff] }
 0x39a   : > { %784 = vadd.xlane.f32.xlu0 %v783_v15  ;;  %v1457_v58 = vpack.c.bf16 %v940_v57, %v939_v56 }
 0x39b   : > { %v782_v16 = vmul.f32 %v780_v14, %v780_v14 }
 0x39d   : > { %v786_v18 = vsel %vm752_vm1, %v782_v16, 0.0 }
 0x39e   : > { %787 = vadd.xlane.f32.xlu1 %v786_v18 }
 0x3af   : > { %829 = vperm.xlu1 %1554, %v819_v24  }
 0x3b0   : > { %797 = vperm.xlu0 %1553, %v767_v63   ;;  %v944_v63 = vld [vmem:[%s2188_s9 + $0x48] sm:$0xff] }
 0x3b1   : > { %v1465_v0 = vpack.c.bf16 %v944_v63, %v943_v62 }
 0x3b3   : > { %802 = vperm.xlu1 %1554, %v768_v2   ;;  %v946_v2 = vld [vmem:[%s2188_s9 + $0x58] sm:$0xff] }
 0x3b4   : > { %v1469_v3 = vpack.c.bf16 %v946_v2, %v945_v1 }
 0x3b7   : > { %834 = vperm.xlu1 %1554, %v826_v28  }
 0x427   : > { %v785_v35 = vpop.xlane.xlu0 %784 }
 0x428   : > { %v789_v36 = vmax.f32 %v785_v35, 1e-24 }
 0x42a   : > { %1563 = vrsqrt.f32 %v789_v36 }
 0x42b   : > { %v788_v37 = vpop.xlane.xlu1 %787 }
 0x42c   : > { %v790_v38 = vmax.f32 %v788_v37, 1e-24 }
 0x42e   : > { %1565 = vrsqrt.f32 %v790_v38 }
 0x42f   : > { %v830_v39 = vpop.permute.xlu1 %829  ;;  %v798_v41 = vpop.permute.xlu0 %797 }
 0x430   : > { %v805_v45 = vmul.f32 %v798_v41, %v2094_v54 }
 0x433   : > { %v803_v42 = vpop.permute.xlu1 %802 }
 0x434   : > { %v1564_v40 = vpop.eup %1563  ;;  %v806_v52 = vmul.f32 %v803_v42, %v2098_v59  ;;  %v941_v59 = vld [vmem:[%s2188_s9 + $0x30] sm:$0xff] }
 0x435   : > { %v793_v43 = vmul.f32 %v1564_v40, %v779_v8  ;;  %v1461_v61 = vpack.c.bf16 %v942_v60, %v941_v59  ;;  %v949_v8 = vld [vmem:[%s2188_s9 + $0x70] sm:$0xff] }
 0x436   : > { %v1477_v10 = vpack.c.bf16 %v950_v9, %v949_v8 }
 0x437   : > { %v837_v44 = vmul.f32 %v830_v39, %v793_v43  ;;  %v835_v49 = vpop.permute.xlu1 %834 }
 0x438   : > { %v1566_v46 = vpop.eup %1565 }
 0x439   : > { %v794_v47 = vmul.f32 %v1566_v46, %v780_v14  ;;  %v839_v48 = vadd.f32 %v837_v44, %v805_v45 }
 0x43b   : > { %v838_v53 = vmul.f32 %v835_v49, %v794_v47  ;;  %841 = vst.msk [vmem:[%s547_s15] sm:$0xff] %vm752_vm1, %v839_v48  ;;  %1367 = vmatprep.mubr.msk.f32.mxu0 %vm752_vm1, %v839_v48 }
 0x43d   : > { %v840_v54 = vadd.f32 %v838_v53, %v806_v52 }
 0x43f   : > { %842 = vst.msk [vmem:[%s547_s15 + $0x8] sm:$0xff] %vm752_vm1, %v840_v54  ;;  %1368 = vmatmul.mubr.msk.f32.vlgmr.msra.gmra.mrb[0].mxu0 %vm752_vm1, %v840_v54 }
 0x440   : > { %1452 = vmatpush3.bf16.msra.mxu0 %v1449_v34 }
 0x441   : > { %1454 = vmatprep.subr.bf16.mxu0 %v1453_v55 }
 0x444   : > { %1456 = vmatpush3.bf16.msra.mxu0 %v1453_v55 }
 0x445   : > { %1458 = vmatprep.subr.bf16.mxu0 %v1457_v58 }
 0x448   : > { %1460 = vmatpush3.bf16.msra.mxu0 %v1457_v58 }
 0x449   : > { %1462 = vmatprep.subr.bf16.mxu0 %v1461_v61 }
 0x44c   : > { %1464 = vmatpush3.bf16.msra.mxu0 %v1461_v61 }
 0x44d   : > { %1466 = vmatprep.subr.bf16.mxu0 %v1465_v0 }
 0x450   : > { %1468 = vmatpush3.bf16.msra.mxu0 %v1465_v0 }
 0x451   : > { %1470 = vmatprep.subr.bf16.mxu0 %v1469_v3 }
 0x454   : > { %1472 = vmatpush3.bf16.msra.mxu0 %v1469_v3 }
 0x455   : > { %1474 = vmatprep.subr.bf16.mxu0 %v1473_v7 }
 0x458   : > { %1476 = vmatpush3.bf16.msra.mxu0 %v1473_v7 }
 0x459   : > { %1478 = vmatprep.subr.bf16.mxu0 %v1477_v10 }
 0x45c   : > { %1480 = vmatpush3.bf16.msra.mxu0 %v1477_v10 }
 0x512   : > { %v1369_v13 = vpop.f32.mrb[0].mxu0 }
 0x513   : > { %v930_v14 = vadd.f32 %v1369_v13, %v1263_v11  ;;  %v924_v15 = vpop.f32.mrb[1].mxu0 }
 0x514   : > { %v925_v16 = vadd.f32 %v1263_v11, %v924_v15 }
 0x515   : > { %v934_v18 = vmax.f32 %v930_v14, 0.0 }
 0x516   : > { %v933_v17 = vmax.f32 %v925_v16, 0.0 }
 0x518   : > { %1402 = vmatprep.mubr.f32.mxu0 %v933_v17 }
 0x519   : > { %1403 = vmatmul.mubr.f32.vlgmr.msra.gmra.mrb[2].mxu0 %v934_v18 }
 0x5ec   : > { %v1404_v20 = vpop.f32.mrb[2].mxu0 }
 0x5ed   : > { %v1030_v21 = vadd.f32 %v1404_v20, %v1266_v19  ;;  %v1024_v22 = vpop.f32.mrb[3].mxu0 }
 0x5ee   : > { %v1025_v23 = vadd.f32 %v1266_v19, %v1024_v22 }
 0x5ef   : > { %v1268_v24 = vmul.f32 -1.442695, %v1030_v21 }
 0x5f0   : > { %v1267_v25 = vmul.f32 -1.442695, %v1025_v23 }
 0x5f1   : > { %1567 = vpow2.f32 %v1268_v24 }
 0x5f2   : > { %1569 = vpow2.f32 %v1267_v25 }
 0x5fb   : > { %v1568_v26 = vpop.eup %1567 }
 0x5fc   : > { %v1570_v27 = vpop.eup %1569  ;;  %v1040_v28 = vadd.f32 1.0, %v1568_v26 }
 0x5fd   : > { %v1039_v29 = vadd.f32 1.0, %v1570_v27 }
 0x5fe   : > { %1571 = vrcp.f32 %v1040_v28 }
 0x5ff   : > { %1573 = vrcp.f32 %v1039_v29 }
 0x608   : > { %v1572_v30 = vpop.eup %1571 }
 0x609   : > { %v1574_v31 = vpop.eup %1573  ;;  %v1046_v32 = vsub.f32 %v1572_v30, %v2048_v12 }
 0x60a   : > { %v1045_v33 = vsub.f32 %v1574_v31, %v2032_v5 }
 0x60b   : > { %v1048_v34 = vmul.f32 %v1046_v32, %v1046_v32 }
 0x60c   : > { %v1047_v35 = vmul.f32 %v1045_v33, %v1045_v33 }
 0x60d   : > { %v1052_v36 = vsel %vm568_vm0, %v1048_v34, 0.0 }
 0x60e   : > { %1053 = vadd.xlane.f32.xlu0 %v1052_v36  ;;  %v1049_v37 = vsel %vm568_vm0, %v1047_v35, 0.0 }
 0x60f   : > { %1050 = vadd.xlane.f32.xlu1 %v1049_v37 }
 0x69b   : > { %v1054_v39 = vpop.xlane.xlu0 %1053 }
 0x69c   : > { %v1051_v38 = vpop.xlane.xlu1 %1050  ;;  %1057 = vst.msk [vmem:[%s553_s28 + $0x8] sm:$0xff] %vm1055_vm6, %v1054_v39 }
 0x69d   : > { %1056 = vst.msk [vmem:[%s553_s28] sm:$0xff] %vm1055_vm6, %v1051_v38 }
 0x69e PF: > { %s27_s21 = sadd.s32 1, %s1765_s21  }
 0x69f   : > { %p24_p7 = scmp.ge.s32.totalorder %s27_s21, 4  }
 0x6a1   :  { %26 = sbr.rel (!%p24_p7) target bundleno = 6 (0x6), region = 137 }
 0x6a8   :  { %1097 = vsyncpa [#allocation3], 1 }
 0x6a9   :  { %1099 = vsyncpa [#allocation3 + $0x1], 1 }
 0x6aa   :  { %1100 = vsyncpa [#allocation5], 1 }
 0x6ab   :  { %1101 = vsyncpa [#allocation8], 1 }
 0x6ac   :  { %1102 = vsyncpa [#allocation11], 1 }

</bundles_post_ra>
